<compile_context>
chip_gen: v6e
topology: v6e:2x2x1
jax: 0.10.0
libtpu: 0.0.40
codegen_flags: <defaults>
</compile_context>

<pallas_src>
import functools

import jax
import jax.numpy as jnp
from jax.experimental import pallas as pl
from jax.experimental.pallas import tpu as pltpu

_LANE = 128
_SUBLANE = 8          # f32 sublane count; scaled by packing factor per dtype
_MIN_GRID_STEPS = 4   # >= 2 steps per TensorCore on v7x, keeps pipeline busy


def _h_sigmoid_kernel(x_ref, o_ref, *, scale):
    # ReLU6(x + 3) * h_max / 6  ==  clip(x + 3, 0, 6) * (h_max / 6)
    x = x_ref[...].astype(jnp.float32)          # f32 math; no-op for f32 input
    y = jnp.clip(x + 3.0, 0.0, 6.0) * scale
    o_ref[...] = y.astype(o_ref.dtype)


def _default_block_bytes():
    """Generation-aware input-tile byte budget (HBM-roofline sweet spot)."""
    try:
        kind = jax.devices()[0].device_kind.lower()
    except Exception:  # pragma: no cover - no backend available
        return 2 << 20
    if "v7" in kind:
        return 8 << 20      # ~3.2 TB/s per TC: 2 MiB tiles lose ~20-25% to overhead
    if "v6" in kind:
        return 4 << 20      # ~1.4 TB/s: halves per-step overhead vs 2 MiB
    return 2 << 20          # v5e/older: 2 MiB already <7% overhead


@functools.partial(jax.jit, static_argnames=("h_max", "block_bytes"))
def h_sigmoid(x, h_max=1.0, *, block_bytes=None):
    """Elementwise hard-sigmoid, dtype preserving. x: any shape (e.g. NCHW)."""
    h_max = float(h_max)                 # static; baked into the kernel
    orig_shape = x.shape
    orig_dtype = x.dtype
    n = x.size
    if n == 0:
        return x
    itemsize = jnp.dtype(orig_dtype).itemsize
    if block_bytes is None:
        block_bytes = _default_block_bytes()

    # dtype-aware sublane granularity: 8 for 4-byte, 16 for bf16, 32 for int8/fp8
    sub = max(_SUBLANE, (_SUBLANE * 4) // max(itemsize, 1))

    # Flatten; pad only to lane (128-element) granularity, and only if needed.
    n_pad = pl.cdiv(n, _LANE) * _LANE
    x_flat = jnp.ravel(x)
    if n_pad != n:
        x_flat = jnp.pad(x_flat, (0, n_pad - n))     # same dtype, no promotion
    rows = n_pad // _LANE
    x2d = x_flat.reshape(rows, _LANE)

    # Block rows from the byte budget (multiple of the packed sublane count),
    # capped so the grid has >= _MIN_GRID_STEPS steps whenever possible
    # (pipelining + both v7x TensorCores for medium tensors).
    target_rows = max(sub, (block_bytes // (_LANE * itemsize)) // sub * sub)
    cap_rows = max(sub, (rows // _MIN_GRID_STEPS) // sub * sub)
    block_rows = int(min(target_rows, cap_rows, rows))
    grid = (pl.cdiv(rows, block_rows),)   # ragged last block -> masked by Pallas

    tile_bytes = block_rows * _LANE * itemsize
    vmem_needed = 2 * 2 * tile_bytes + (2 << 20)   # dbl-buffered in+out + headroom
    compiler_params = pltpu.CompilerParams(
        dimension_semantics=("parallel",),          # megacore-shardable on v7x
        vmem_limit_bytes=int(max(vmem_needed, 16 << 20)),
    )

    kernel = functools.partial(_h_sigmoid_kernel, scale=h_max / 6.0)
    out2d = pl.pallas_call(
        kernel,
        out_shape=jax.ShapeDtypeStruct((rows, _LANE), orig_dtype),
        grid_spec=pltpu.PrefetchScalarGridSpec(
            num_scalar_prefetch=0,
            grid=grid,
            in_specs=[pl.BlockSpec((block_rows, _LANE), lambda i: (i, 0))],
            out_specs=pl.BlockSpec((block_rows, _LANE), lambda i: (i, 0)),
        ),
        compiler_params=compiler_params,
        cost_estimate=pl.CostEstimate(
            flops=4 * n, transcendentals=0, bytes_accessed=2 * n * itemsize),
    )(x2d)

    if n_pad == n:
        return out2d.reshape(orig_shape)             # no pad -> no tail slice
    return out2d.reshape(-1)[:n].reshape(orig_shape)


if __name__ == "__main__":
    key = jax.random.PRNGKey(0)

    def ref(x, h_max=1.0):
        xf = x.astype(jnp.float32)
        return jnp.clip(xf + 3.0, 0.0, 6.0) * h_max / 6.0

    # 1) NCHW f32, size divisible by 128: no pad, no tail slice.
    x = jax.random.normal(key, (2, 4, 16, 16), dtype=jnp.float32) * 4.0
    y = jax.block_until_ready(h_sigmoid(x, h_max=1.0))
    assert y.shape == x.shape and y.dtype == x.dtype
    assert jnp.allclose(y, ref(x), atol=1e-6), "f32 mismatch vs reference"

    # 2) bf16 stays bf16 in HBM; math is f32 in-register.
    xb = x.astype(jnp.bfloat16)
    yb = jax.block_until_ready(h_sigmoid(xb, h_max=1.0))
    assert yb.dtype == jnp.bfloat16
    assert jnp.allclose(yb.astype(jnp.float32), ref(xb),
                        atol=1e-2), "bf16 mismatch vs reference"

    # 3) Odd size + small block override: lane-granularity padding and the
    #    ragged (cdiv) last grid block.
    x3 = jax.random.normal(jax.random.PRNGKey(1), (2, 3, 20, 20),
                           dtype=jnp.float32) * 4.0
    y3 = jax.block_until_ready(
        h_sigmoid(x3, h_max=2.0, block_bytes=16 * _LANE * 4))
    assert y3.shape == x3.shape
    assert jnp.allclose(y3, ref(x3, 2.0), atol=1e-6), "ragged-path mismatch"

    # 4) Medium tensor with default (generation-aware) block size: exercises
    #    the >=4-step grid cap so the pipeline / both v7x cores stay busy.
    x4 = jax.random.normal(jax.random.PRNGKey(2), (2, 64, 32, 32),
                           dtype=jnp.float32) * 4.0
    y4 = jax.block_until_ready(h_sigmoid(x4, h_max=1.0))
    assert y4.shape == x4.shape
    assert jnp.allclose(y4, ref(x4), atol=1e-6), "medium-tensor mismatch"

    print("KERNEL_OK")
</pallas_src>

<mosaic_0001>
module attributes {stable_mosaic.version = 11 : i64} {
  func.func @_h_sigmoid_kernel(%arg0: i32, %arg1: memref<8x128xf32, #tpu.memory_space<vmem>>, %arg2: memref<8x128xf32, #tpu.memory_space<vmem>>) attributes {dimension_semantics = [#tpu.dimension_semantics<parallel>], iteration_bounds = array<i64: 2>, scalar_prefetch = 0 : i64, scratch_operands = 0 : i64, tpu.core_type = #tpu.core_type<tc>, window_params = [{transform_indices = @transform_0, window_bounds = array<i64: 8, 128>}, {transform_indices = @transform_1, window_bounds = array<i64: 8, 128>}]} {
    %c0 = arith.constant 0 : index
    %c0_0 = arith.constant 0 : index
    %0 = vector.load %arg1[%c0, %c0_0] : memref<8x128xf32, #tpu.memory_space<vmem>>, vector<8x128xf32>
    %cst = arith.constant 3.000000e+00 : f32
    %1 = vector.broadcast %cst : f32 to vector<8x128xf32>
    %2 = arith.addf %0, %1 : vector<8x128xf32>
    %cst_1 = arith.constant 0.000000e+00 : f32
    %cst_2 = arith.constant 6.000000e+00 : f32
    %3 = vector.broadcast %cst_1 : f32 to vector<8x128xf32>
    %4 = arith.maximumf %3, %2 : vector<8x128xf32>
    %5 = vector.broadcast %cst_2 : f32 to vector<8x128xf32>
    %6 = arith.minimumf %5, %4 : vector<8x128xf32>
    %cst_3 = arith.constant 0.166666672 : f32
    %7 = vector.broadcast %cst_3 : f32 to vector<8x128xf32>
    %8 = arith.mulf %6, %7 : vector<8x128xf32>
    %c0_4 = arith.constant 0 : index
    %c0_5 = arith.constant 0 : index
    %9 = vector.load %arg2[%c0_4, %c0_5] : memref<8x128xf32, #tpu.memory_space<vmem>>, vector<8x128xf32>
    tpu.vector_store %arg2[%c0_4, %c0_5], %8 {strides = array<i32>} : memref<8x128xf32, #tpu.memory_space<vmem>>, vector<8x128xf32>,
    return
  }
  func.func @transform_0(%arg0: i32) -> (i32, i32) {
    %c0_i32 = arith.constant 0 : i32
    %c0_i32_0 = arith.constant 0 : i32
    return %arg0, %c0_i32 : i32, i32
  }
  func.func @transform_1(%arg0: i32) -> (i32, i32) {
    %c0_i32 = arith.constant 0 : i32
    %c0_i32_0 = arith.constant 0 : i32
    return %arg0, %c0_i32 : i32, i32
  }
}

</mosaic_0001>

<bundles_post_ra>
// kernel: h_sigmoid.1
= control target key start
LH: loop header
LB: loop body
LE: loop exit
PB: predicated region body
PF: predicated region fallthrough
CT: control target
= control target key end

     0   :  { %s192_s6 = smov 0   ;;  %s212_s0 = inlined_call_operand.vmem [shape: f32[16,128], index: 0, kind: input, shape index: {}]   ;;  %s213_s1 = inlined_call_operand.vmem [shape: f32[16,128], index: 1, kind: output, shape index: {}]  }
   0x1 LB: > { %s171_s7 = sadd.s32 4294967295, %s194_s6   ;;  %p175_p0 = scmp.ge.s32.totalorder %s194_s6, 1  ;;  %s194_s6 = sphi %s192_s6, %s11_s6  }
   0x2   : > { %p86_p1 = scmp.lt.s32.totalorder %s194_s6, 3 }
   0x4   : > { %p87_p2 = pnand %p175_p0, %p86_p1 }
   0x5   : > { %p104_p3 = scmp.lt.s32.totalorder (!%p87_p2), %s171_s7, 1 }
   0x6   : > { %90 = sbr.rel (%p87_p2) target bundleno = 24 (0x18), region = 24 }
   0xb   : > { %s215_s7 = smov (!%p104_p3, %s171_s7), 1 }
   0xc   : > { %s176_s8 = sshll.u32 %s215_s7, 3 }
   0xd   : > { %s107_s11 = scalar_lea.vmem %s212_s0, %s176_s8  ;;  %s111_s14 = scalar_lea.vmem %s213_s1, %s176_s8 }
   0xe   : > { %v112_v0 = vld [vmem:[%s107_s11] sm:$0xff] }
   0xf   : > { %v113_v1 = vadd.f32 3.0, %v112_v0 }
  0x11   : > { %v114_v2 = vmax.f32 %v113_v1, 0.0 }
  0x13   : > { %v115_v3 = vmin.f32 %v114_v2, 6.0 }
  0x15   : > { %v116_v4 = vmul.f32 0.16666667, %v115_v3 }
  0x17   : > { %117 = vst [vmem:[%s111_s14] sm:$0xff] %v116_v4 }
  0x18 PF: > { %s11_s6 = sadd.s32 1, %s194_s6  }
  0x19   : > { %p8_p4 = scmp.ge.s32.totalorder %s11_s6, 4  }
  0x1b   :  { %10 = sbr.rel (!%p8_p4) target bundleno = 1 (0x1), region = 54 }

</bundles_post_ra>
